<compile_context>
chip_gen: v7x
topology: tpu7x:2x2x1
jax: 0.10.0
libtpu: 0.0.40
codegen_flags: <defaults>
</compile_context>

<pallas_src>
import functools

import jax
import jax.numpy as jnp
from jax.experimental import pallas as pl
from jax.experimental.pallas import tpu as pltpu

_LANES = 128
_TR_MAX = 2048          # rows (of 128 lanes = 32 boxes) per tile -> 1 MiB f32 blocks

# pltpu.roll follows the np.roll convention: roll(x, s, axis=1)[:, i] == x[:, i - s].
_SHIFT_M2 = 2           # out[:, i] = x[:, i - 2]
_SHIFT_P2 = _LANES - 2  # out[:, i] = x[:, i + 2]   (-2 mod 128)


def _bbox_transform_kernel(params_ref, boxes_ref, deltas_ref, out_ref):
    # boxes_ref / deltas_ref / out_ref: (TR, 128), lanes interleaved
    # [x1, y1, x2, y2] * 32 per row.  params_ref: (8, 128) f32 per-lane constants.
    boxes = boxes_ref[...].astype(jnp.float32)
    deltas = deltas_ref[...].astype(jnp.float32)

    # (1, 128) per-lane parameter rows; broadcast over sublanes on the VPU
    # (VPU has ample slack under the HBM roofline for this op).
    mean_c = params_ref[0:1, :]   # dx/dy mean, per lane
    mean_s = params_ref[1:2, :]   # dw/dh mean, per lane
    std_c = params_ref[2:3, :]    # dx/dy std,  per lane
    std_s = params_ref[3:4, :]    # dw/dh std,  per lane
    sgn = params_ref[4:5, :]      # -0.5 on x1/y1 lanes, +0.5 on x2/y2 lanes
    is_hi = sgn > 0.0             # lanes holding x2/y2 (lane % 4 in {2, 3})

    # Lane rotations to reach the partner coordinate of the same box (lane XOR 2).
    # Wrapped lanes of each rotation are never selected (lanes 0/1 are "lo",
    # lanes 126/127 are "hi"), so wrap-around is harmless.
    b_m2 = pltpu.roll(boxes, shift=_SHIFT_M2, axis=1)    # boxes[:, i-2]
    b_p2 = pltpu.roll(boxes, shift=_SHIFT_P2, axis=1)    # boxes[:, i+2]
    d_m2 = pltpu.roll(deltas, shift=_SHIFT_M2, axis=1)
    d_p2 = pltpu.roll(deltas, shift=_SHIFT_P2, axis=1)

    p1 = jnp.where(is_hi, b_m2, boxes)       # x1 (even lanes) / y1 (odd lanes)
    p2 = jnp.where(is_hi, boxes, b_p2)       # x2 / y2
    d_ctr = jnp.where(is_hi, d_m2, deltas)   # dx / dy
    d_sz = jnp.where(is_hi, deltas, d_p2)    # dw / dh

    size = p2 - p1                           # widths (x lanes) / heights (y lanes)
    ctr = p1 + 0.5 * size                    # ctr_x / ctr_y
    d_ctr = d_ctr * std_c + mean_c
    d_sz = d_sz * std_s + mean_s
    pred_ctr = ctr + d_ctr * size
    pred_sz = jnp.exp(d_sz) * size           # pred_w / pred_h (EUP; no clamp, as in the module)
    out_ref[...] = (pred_ctr + sgn * pred_sz).astype(out_ref.dtype)


def _round_up(x, m):
    return ((x + m - 1) // m) * m


def _make_params(mean, std):
    """(8, 128) f32 per-lane constant slab for the period-4 lane interleave."""
    mean = jnp.asarray(mean, jnp.float32)
    std = jnp.asarray(std, jnp.float32)
    mean_c = jnp.tile(mean[:2], _LANES // 2)
    mean_s = jnp.tile(mean[2:], _LANES // 2)
    std_c = jnp.tile(std[:2], _LANES // 2)
    std_s = jnp.tile(std[2:], _LANES // 2)
    sgn = jnp.tile(jnp.array([-0.5, -0.5, 0.5, 0.5], jnp.float32), _LANES // 4)
    zero = jnp.zeros((_LANES,), jnp.float32)
    return jnp.stack([mean_c, mean_s, std_c, std_s, sgn, zero, zero, zero], axis=0)


def _run_main_kernel(params, boxes2d, deltas2d, out_dtype, tile_rows):
    rows = boxes2d.shape[0]
    # (8,128) block alignment; bf16 packs 2 rows/sublane -> use 16-row multiples.
    align = 16 if boxes2d.dtype == jnp.bfloat16 else 8
    tile_rows_a = max(align, (int(tile_rows) // align) * align)
    if rows <= align:
        tr = rows                                   # single full-extent block
    else:
        # Split into >= 2 blocks so the "parallel" axis shards across both
        # TensorCores on v7x even when everything would fit in one tile.
        tr = min(tile_rows_a, _round_up(pl.cdiv(rows, 2), align))
    grid = (pl.cdiv(rows, tr),)

    coord_spec = pl.BlockSpec((tr, _LANES), lambda i: (i, 0))
    return pl.pallas_call(
        _bbox_transform_kernel,
        out_shape=jax.ShapeDtypeStruct((rows, _LANES), out_dtype),
        grid_spec=pltpu.PrefetchScalarGridSpec(
            num_scalar_prefetch=0,
            grid=grid,
            in_specs=[
                pl.BlockSpec((8, _LANES), lambda i: (0, 0)),  # params (resident)
                coord_spec,                                   # boxes
                coord_spec,                                   # deltas
            ],
            out_specs=coord_spec,
        ),
        compiler_params=pltpu.CompilerParams(
            dimension_semantics=("parallel",),
            vmem_limit_bytes=32 * 1024 * 1024,
        ),
    )(params, boxes2d, deltas2d)


def _bbox_tail(boxes, deltas, mean, std):
    """Pure-JAX epilogue for a (K, 4) tail of < 32 boxes (f32)."""
    w = boxes[:, 2] - boxes[:, 0]
    h = boxes[:, 3] - boxes[:, 1]
    cx = boxes[:, 0] + 0.5 * w
    cy = boxes[:, 1] + 0.5 * h
    dx = deltas[:, 0] * std[0] + mean[0]
    dy = deltas[:, 1] * std[1] + mean[1]
    dw = deltas[:, 2] * std[2] + mean[2]
    dh = deltas[:, 3] * std[3] + mean[3]
    pcx = cx + dx * w
    pcy = cy + dy * h
    pw = jnp.exp(dw) * w
    ph = jnp.exp(dh) * h
    return jnp.stack([pcx - 0.5 * pw, pcy - 0.5 * ph,
                      pcx + 0.5 * pw, pcy + 0.5 * ph], axis=1)


@functools.partial(jax.jit, static_argnames=("tile_rows",))
def bbox_transform(boxes, deltas, mean=None, std=None, *, tile_rows=_TR_MAX):
    """boxes, deltas: (B, N, 4). Returns (B, N, 4) in the (common) input dtype."""
    if mean is None:
        mean = jnp.array([0.0, 0.0, 0.0, 0.0], dtype=jnp.float32)
    if std is None:
        std = jnp.array([0.1, 0.1, 0.2, 0.2], dtype=jnp.float32)
    mean = jnp.asarray(mean, jnp.float32)
    std = jnp.asarray(std, jnp.float32)

    B, N, C = boxes.shape
    assert C == 4, "boxes / deltas must have 4 coords in the last dim"

    # Stream bf16 end-to-end (half the HBM traffic); everything else runs f32.
    if boxes.dtype == jnp.bfloat16 and deltas.dtype == jnp.bfloat16:
        io_dtype = jnp.bfloat16
    else:
        io_dtype = jnp.float32
    boxes = boxes.astype(io_dtype)     # no-op when dtype already matches
    deltas = deltas.astype(io_dtype)

    params = _make_params(mean, std)

    total = B * N * 4
    boxes_per_row = _LANES // 4                            # 32 boxes per 128-lane row
    n_main_boxes = (B * N // boxes_per_row) * boxes_per_row
    main_elems = n_main_boxes * 4                          # multiple of 128
    rows = main_elems // _LANES

    boxes_flat = boxes.reshape(-1)
    deltas_flat = deltas.reshape(-1)

    if main_elems == total:
        # Fast path (B*N multiple of 32 boxes): free contiguous reshape to a
        # lane-dense (rows, 128) slab -- no pads, no slices, no HBM copies
        # outside the kernel.
        boxes2d = boxes_flat.reshape(rows, _LANES)
        deltas2d = deltas_flat.reshape(rows, _LANES)
        out2d = _run_main_kernel(params, boxes2d, deltas2d, io_dtype, tile_rows)
        return out2d.reshape(B, N, 4)

    # Misaligned case: kernel on the 128-aligned prefix, tiny JAX epilogue on the
    # <= 31 trailing boxes.  (Pad B*N to a multiple of 32 at model setup to stay
    # on the copy-free fast path.)
    out_parts = []
    if rows > 0:
        boxes2d = boxes_flat[:main_elems].reshape(rows, _LANES)
        deltas2d = deltas_flat[:main_elems].reshape(rows, _LANES)
        out2d = _run_main_kernel(params, boxes2d, deltas2d, io_dtype, tile_rows)
        out_parts.append(out2d.reshape(-1))
    tail_boxes = boxes_flat[main_elems:].reshape(-1, 4).astype(jnp.float32)
    tail_deltas = deltas_flat[main_elems:].reshape(-1, 4).astype(jnp.float32)
    tail_out = _bbox_tail(tail_boxes, tail_deltas, mean, std).astype(io_dtype)
    out_parts.append(tail_out.reshape(-1))
    return jnp.concatenate(out_parts).reshape(B, N, 4)


def _bbox_transform_ref(boxes, deltas, mean, std):
    """Pure-JAX reference mirroring the PyTorch forward (f32)."""
    widths = boxes[:, :, 2] - boxes[:, :, 0]
    heights = boxes[:, :, 3] - boxes[:, :, 1]
    ctr_x = boxes[:, :, 0] + 0.5 * widths
    ctr_y = boxes[:, :, 1] + 0.5 * heights
    dx = deltas[:, :, 0] * std[0] + mean[0]
    dy = deltas[:, :, 1] * std[1] + mean[1]
    dw = deltas[:, :, 2] * std[2] + mean[2]
    dh = deltas[:, :, 3] * std[3] + mean[3]
    pred_ctr_x = ctr_x + dx * widths
    pred_ctr_y = ctr_y + dy * heights
    pred_w = jnp.exp(dw) * widths
    pred_h = jnp.exp(dh) * heights
    return jnp.stack([pred_ctr_x - 0.5 * pred_w,
                      pred_ctr_y - 0.5 * pred_h,
                      pred_ctr_x + 0.5 * pred_w,
                      pred_ctr_y + 0.5 * pred_h], axis=2)


if __name__ == "__main__":
    key = jax.random.PRNGKey(0)
    mean = jnp.array([0.0, 0.0, 0.0, 0.0], dtype=jnp.float32)
    std = jnp.array([0.1, 0.1, 0.2, 0.2], dtype=jnp.float32)

    def make_inputs(k, B, N):
        k1, k2, k3 = jax.random.split(k, 3)
        xy1 = jax.random.uniform(k1, (B, N, 2), jnp.float32, 0.0, 100.0)
        wh = jax.random.uniform(k2, (B, N, 2), jnp.float32, 1.0, 50.0)
        bxs = jnp.concatenate([xy1, xy1 + wh], axis=-1)          # valid boxes
        dls = jax.random.normal(k3, (B, N, 4), jnp.float32)
        return bxs, dls

    # Aligned fast path (B*N multiple of 32): B=2, N=256 -> 16 rows, 2 blocks.
    k_a, k_b = jax.random.split(key)
    boxes, deltas = make_inputs(k_a, 2, 256)
    out = jax.block_until_ready(bbox_transform(boxes, deltas, mean, std))
    ref = _bbox_transform_ref(boxes, deltas, mean, std)
    assert out.shape == (2, 256, 4) and out.dtype == jnp.float32
    assert jnp.allclose(out, ref, atol=1e-4, rtol=1e-4), "mismatch (aligned path)"

    # Misaligned tail path (B*N = 500, tail of 20 boxes handled in JAX epilogue).
    boxes_t, deltas_t = make_inputs(k_b, 2, 250)
    out_t = jax.block_until_ready(bbox_transform(boxes_t, deltas_t, mean, std))
    ref_t = _bbox_transform_ref(boxes_t, deltas_t, mean, std)
    assert out_t.shape == (2, 250, 4)
    assert jnp.allclose(out_t, ref_t, atol=1e-4, rtol=1e-4), "mismatch (tail path)"

    print("KERNEL_OK")
</pallas_src>

<mosaic_0001>
module attributes {stable_mosaic.version = 11 : i64} {
  func.func @_bbox_transform_kernel(%arg0: i32, %arg1: memref<8x128xf32, #tpu.memory_space<vmem>>, %arg2: memref<8x128xf32, #tpu.memory_space<vmem>>, %arg3: memref<8x128xf32, #tpu.memory_space<vmem>>, %arg4: memref<8x128xf32, #tpu.memory_space<vmem>>) attributes {dimension_semantics = [#tpu.dimension_semantics<parallel>], iteration_bounds = array<i64: 2>, scalar_prefetch = 0 : i64, scratch_operands = 0 : i64, tpu.core_type = #tpu.core_type<tc>, window_params = [{pipeline_mode = #tpu.pipeline_mode<synchronous>, transform_indices = @transform_0, window_bounds = array<i64: 8, 128>}, {transform_indices = @transform_1, window_bounds = array<i64: 8, 128>}, {transform_indices = @transform_2, window_bounds = array<i64: 8, 128>}, {transform_indices = @transform_3, window_bounds = array<i64: 8, 128>}]} {
    %c0 = arith.constant 0 : index
    %c0_0 = arith.constant 0 : index
    %0 = vector.load %arg2[%c0, %c0_0] : memref<8x128xf32, #tpu.memory_space<vmem>>, vector<8x128xf32>
    %c0_1 = arith.constant 0 : index
    %c0_2 = arith.constant 0 : index
    %1 = vector.load %arg3[%c0_1, %c0_2] : memref<8x128xf32, #tpu.memory_space<vmem>>, vector<8x128xf32>
    %c0_3 = arith.constant 0 : index
    %c0_4 = arith.constant 0 : index
    %2 = vector.load %arg1[%c0_3, %c0_4] : memref<8x128xf32, #tpu.memory_space<vmem>>, vector<1x128xf32>
    %c1 = arith.constant 1 : index
    %c0_5 = arith.constant 0 : index
    %3 = vector.load %arg1[%c1, %c0_5] : memref<8x128xf32, #tpu.memory_space<vmem>>, vector<1x128xf32>
    %c2 = arith.constant 2 : index
    %c0_6 = arith.constant 0 : index
    %4 = vector.load %arg1[%c2, %c0_6] : memref<8x128xf32, #tpu.memory_space<vmem>>, vector<1x128xf32>
    %c3 = arith.constant 3 : index
    %c0_7 = arith.constant 0 : index
    %5 = vector.load %arg1[%c3, %c0_7] : memref<8x128xf32, #tpu.memory_space<vmem>>, vector<1x128xf32>
    %c4 = arith.constant 4 : index
    %c0_8 = arith.constant 0 : index
    %6 = vector.load %arg1[%c4, %c0_8] : memref<8x128xf32, #tpu.memory_space<vmem>>, vector<1x128xf32>
    %cst = arith.constant 0.000000e+00 : f32
    %7 = vector.broadcast %cst : f32 to vector<1x128xf32>
    %8 = arith.cmpf ogt, %6, %7 : vector<1x128xf32>
    %c2_i32 = arith.constant 2 : i32
    %9 = tpu.dynamic_rotate %0 by %c2_i32 dim 1 : vector<8x128xf32>, i32 -> vector<8x128xf32>
    %c126_i32 = arith.constant 126 : i32
    %10 = tpu.dynamic_rotate %0 by %c126_i32 dim 1 : vector<8x128xf32>, i32 -> vector<8x128xf32>
    %c2_i32_9 = arith.constant 2 : i32
    %11 = tpu.dynamic_rotate %1 by %c2_i32_9 dim 1 : vector<8x128xf32>, i32 -> vector<8x128xf32>
    %c126_i32_10 = arith.constant 126 : i32
    %12 = tpu.dynamic_rotate %1 by %c126_i32_10 dim 1 : vector<8x128xf32>, i32 -> vector<8x128xf32>
    %13 = vector.shape_cast %8 : vector<1x128xi1> to vector<1x128xi1>
    %14 = vector.broadcast %13 : vector<1x128xi1> to vector<8x128xi1>
    %15 = arith.select %14, %9, %0 : vector<8x128xi1>, vector<8x128xf32>
    %16 = vector.shape_cast %8 : vector<1x128xi1> to vector<1x128xi1>
    %17 = vector.broadcast %16 : vector<1x128xi1> to vector<8x128xi1>
    %18 = arith.select %17, %0, %10 : vector<8x128xi1>, vector<8x128xf32>
    %19 = vector.shape_cast %8 : vector<1x128xi1> to vector<1x128xi1>
    %20 = vector.broadcast %19 : vector<1x128xi1> to vector<8x128xi1>
    %21 = arith.select %20, %11, %1 : vector<8x128xi1>, vector<8x128xf32>
    %22 = vector.shape_cast %8 : vector<1x128xi1> to vector<1x128xi1>
    %23 = vector.broadcast %22 : vector<1x128xi1> to vector<8x128xi1>
    %24 = arith.select %23, %1, %12 : vector<8x128xi1>, vector<8x128xf32>
    %25 = arith.subf %18, %15 : vector<8x128xf32>
    %cst_11 = arith.constant 5.000000e-01 : f32
    %26 = vector.broadcast %cst_11 : f32 to vector<8x128xf32>
    %27 = arith.mulf %26, %25 : vector<8x128xf32>
    %28 = arith.addf %15, %27 : vector<8x128xf32>
    %29 = vector.broadcast %4 : vector<1x128xf32> to vector<8x128xf32>
    %30 = arith.mulf %21, %29 : vector<8x128xf32>
    %31 = vector.broadcast %2 : vector<1x128xf32> to vector<8x128xf32>
    %32 = arith.addf %30, %31 : vector<8x128xf32>
    %33 = vector.broadcast %5 : vector<1x128xf32> to vector<8x128xf32>
    %34 = arith.mulf %24, %33 : vector<8x128xf32>
    %35 = vector.broadcast %3 : vector<1x128xf32> to vector<8x128xf32>
    %36 = arith.addf %34, %35 : vector<8x128xf32>
    %37 = arith.mulf %32, %25 : vector<8x128xf32>
    %38 = arith.addf %28, %37 : vector<8x128xf32>
    %39 = math.exp %36 : vector<8x128xf32>
    %40 = arith.mulf %39, %25 : vector<8x128xf32>
    %41 = vector.broadcast %6 : vector<1x128xf32> to vector<8x128xf32>
    %42 = arith.mulf %41, %40 : vector<8x128xf32>
    %43 = arith.addf %38, %42 : vector<8x128xf32>
    %c0_12 = arith.constant 0 : index
    %c0_13 = arith.constant 0 : index
    %44 = vector.load %arg4[%c0_12, %c0_13] : memref<8x128xf32, #tpu.memory_space<vmem>>, vector<8x128xf32>
    tpu.vector_store %arg4[%c0_12, %c0_13], %43 {strides = array<i32>} : memref<8x128xf32, #tpu.memory_space<vmem>>, vector<8x128xf32>,
    return
  }
  func.func @transform_0(%arg0: i32) -> (i32, i32) {
    %c0_i32 = arith.constant 0 : i32
    %c0_i32_0 = arith.constant 0 : i32
    %c0_i32_1 = arith.constant 0 : i32
    return %c0_i32, %c0_i32_0 : i32, i32
  }
  func.func @transform_1(%arg0: i32) -> (i32, i32) {
    %c0_i32 = arith.constant 0 : i32
    %c0_i32_0 = arith.constant 0 : i32
    return %arg0, %c0_i32 : i32, i32
  }
  func.func @transform_2(%arg0: i32) -> (i32, i32) {
    %c0_i32 = arith.constant 0 : i32
    %c0_i32_0 = arith.constant 0 : i32
    return %arg0, %c0_i32 : i32, i32
  }
  func.func @transform_3(%arg0: i32) -> (i32, i32) {
    %c0_i32 = arith.constant 0 : i32
    %c0_i32_0 = arith.constant 0 : i32
    return %arg0, %c0_i32 : i32, i32
  }
}

</mosaic_0001>

<bundles_post_ra>
// kernel: tile.42
= control target key start
LH: loop header
LB: loop body
LE: loop exit
PB: predicated region body
PF: predicated region fallthrough
CT: control target
= control target key end

     0   :  { %s40_s0 = inlined_call_operand.vmem [shape: f32[4], index: 0, kind: input, shape index: {}]   ;;  %s41_s1 = inlined_call_operand.vmem [shape: f32[32,4], index: 1, kind: output, shape index: {}]  }
   0x1   :  { %v4_v0 = vld [vmem:[%s40_s0] ss:$0 sm:$0xff] }
   0x2   :  { %5 = vst [vmem:[%s41_s1] sm:$0xff] %v4_v0  ;;  %12 = vst [vmem:[%s41_s1 + $0x8] sm:$0xff] %v4_v0 }
   0x3   :  { %13 = vst [vmem:[%s41_s1 + $0x10] sm:$0xff] %v4_v0  ;;  %14 = vst [vmem:[%s41_s1 + $0x18] sm:$0xff] %v4_v0 }

// kernel: tile.39
= control target key start
LH: loop header
LB: loop body
LE: loop exit
PB: predicated region body
PF: predicated region fallthrough
CT: control target
= control target key end

     0   :  { %s64_s0 = inlined_call_operand.vmem [shape: f32[2], index: 0, kind: input, shape index: {}]   ;;  %s65_s1 = inlined_call_operand.vmem [shape: f32[64,2], index: 1, kind: output, shape index: {}]  }
   0x1   :  { %v4_v0 = vld [vmem:[%s64_s0] ss:$0 sm:$0xff] }
   0x2   :  { %5 = vst [vmem:[%s65_s1] sm:$0xff] %v4_v0  ;;  %20 = vst [vmem:[%s65_s1 + $0x8] sm:$0xff] %v4_v0 }
   0x3   :  { %21 = vst [vmem:[%s65_s1 + $0x10] sm:$0xff] %v4_v0  ;;  %22 = vst [vmem:[%s65_s1 + $0x18] sm:$0xff] %v4_v0 }
   0x4   :  { %23 = vst [vmem:[%s65_s1 + $0x20] sm:$0xff] %v4_v0  ;;  %24 = vst [vmem:[%s65_s1 + $0x28] sm:$0xff] %v4_v0 }
   0x5   :  { %25 = vst [vmem:[%s65_s1 + $0x30] sm:$0xff] %v4_v0  ;;  %26 = vst [vmem:[%s65_s1 + $0x38] sm:$0xff] %v4_v0 }

// kernel: tile.47
= control target key start
LH: loop header
LB: loop body
LE: loop exit
PB: predicated region body
PF: predicated region fallthrough
CT: control target
= control target key end

     0   :  { %s259_s10 = smov 124   ;;  %s260_s11 = smov 116   ;;  %vm3_vm0 = vcmask 31744   ;;  %vm9_vm1 = vcmask 1048544   ;;  %vm15_vm2 = vcmask 1015744   ;;  %vm21_vm3 = vcmask 982944   ;;  %s399_s0 = inlined_call_operand.vmem [shape: f32[32,4], index: 0, kind: input, shape index: {}]   ;;  %s400_s1 = inlined_call_operand.vmem [shape: f32[1,128], index: 1, kind: output, shape index: {}]  }
   0x1   :  { %v197_v0 = vld [vmem:[%s399_s0 + $0x1f] sm:$0x1]   ;;  %v199_v1 = vld [vmem:[%s399_s0 + $0x1d] sm:$0x1]   ;;  %v198_v2 = vld [vmem:[%s399_s0 + $0x1e] sm:$0x1]  }
   0x2   :  { %7 = vrot.lane.b32.xlu0 %v197_v0, %s259_s10  ;;  %19 = vrot.lane.b32.xlu1 %v199_v1, %s260_s11  ;;  %v200_v3 = vld [vmem:[%s399_s0 + $0x1c] sm:$0x1]   ;;  %s261_s16 = smov 120   ;;  %s262_s17 = smov 112   ;;  %v201_v4 = vld [vmem:[%s399_s0 + $0x1b] sm:$0x1]  }
   0x3   :  { %v202_v5 = vld [vmem:[%s399_s0 + $0x1a] sm:$0x1]   ;;  %s263_s22 = smov 108   ;;  %s264_s23 = smov 104   ;;  %v203_v6 = vld [vmem:[%s399_s0 + $0x19] sm:$0x1]  }
   0x4   :  { %v204_v7 = vld [vmem:[%s399_s0 + $0x18] sm:$0x1]   ;;  %s265_s28 = smov 100   ;;  %s266_s29 = smov 96   ;;  %v205_v8 = vld [vmem:[%s399_s0 + $0x17] sm:$0x1]  }
   0x5   :  { %v206_v9 = vld [vmem:[%s399_s0 + $0x16] sm:$0x1]   ;;  %v2_v10 = vld [vmem:[%s399_s0] sm:$0x1]   ;;  %s267_s7 = smov 92   ;;  %s268_s8 = smov 88  }
   0x6   :  { %13 = vrot.lane.b32.xlu0 %v198_v2, %s261_s16  ;;  %25 = vrot.lane.b32.xlu1 %v200_v3, %s262_s17  ;;  %4 = vst.msk [vmem:[#allocation0] sm:$0x1] %vm3_vm0, %v2_v10   ;;  %v207_v11 = vld [vmem:[%s399_s0 + $0x15] sm:$0x1]   ;;  %v208_v12 = vld [vmem:[%s399_s0 + $0x14] sm:$0x1]  }
   0x7   :  { %s269_s13 = smov 84   ;;  %s270_s14 = smov 80   ;;  %v209_v13 = vld [vmem:[%s399_s0 + $0x13] sm:$0x1]   ;;  %v210_v14 = vld [vmem:[%s399_s0 + $0x12] sm:$0x1]  }
   0x8   :  { %s271_s19 = smov 76   ;;  %s272_s20 = smov 72   ;;  %v211_v15 = vld [vmem:[%s399_s0 + $0x11] sm:$0x1]   ;;  %v212_v16 = vld [vmem:[%s399_s0 + $0x10] sm:$0x1]  }
   0x9   :  { %s273_s25 = smov 68   ;;  %s274_s26 = smov 64   ;;  %v213_v17 = vld [vmem:[%s399_s0 + $0xf] sm:$0x1]   ;;  %v214_v18 = vld [vmem:[%s399_s0 + $0xe] sm:$0x1]  }
   0xa   :  { %31 = vrot.lane.b32.xlu0 %v201_v4, %s263_s22  ;;  %37 = vrot.lane.b32.xlu1 %v202_v5, %s264_s23  ;;  %s275_s2 = smov 60   ;;  %s276_s3 = smov 56   ;;  %v215_v19 = vld [vmem:[%s399_s0 + $0xd] sm:$0x1]   ;;  %v216_v20 = vld [vmem:[%s399_s0 + $0xc] sm:$0x1]  }
   0xb   :  { %s278_s9 = smov 48   ;;  %v217_v21 = vld [vmem:[%s399_s0 + $0xb] sm:$0x1]   ;;  %v218_v22 = vld [vmem:[%s399_s0 + $0xa] sm:$0x1]   ;;  %s280_s15 = smov 40  }
   0xc   :  { %v219_v23 = vld [vmem:[%s399_s0 + $0x9] sm:$0x1]   ;;  %v220_v24 = vld [vmem:[%s399_s0 + $0x8] sm:$0x1]   ;;  %s282_s21 = smov 32   ;;  %s284_s27 = smov 24  }
   0xd   :  { %v221_v25 = vld [vmem:[%s399_s0 + $0x7] sm:$0x1]   ;;  %v222_v26 = vld [vmem:[%s399_s0 + $0x6] sm:$0x1]   ;;  %v223_v27 = vld [vmem:[%s399_s0 + $0x5] sm:$0x1]  }
   0xe   :  { %43 = vrot.lane.b32.xlu0 %v203_v6, %s265_s28  ;;  %49 = vrot.lane.b32.xlu1 %v204_v7, %s266_s29  ;;  %v224_v28 = vld [vmem:[%s399_s0 + $0x4] sm:$0x1]   ;;  %s286_s4 = smov 16   ;;  %v225_v29 = vld [vmem:[%s399_s0 + $0x3] sm:$0x1]   ;;  %s288_s10 = smov 8  }
   0xf   :  { %v226_v30 = vld [vmem:[%s399_s0 + $0x2] sm:$0x1]   ;;  %v227_v31 = vld [vmem:[%s399_s0 + $0x1] sm:$0x1]   ;;  %s289_s0 = smov 4   ;;  %vm27_vm4 = vcmask 950144  }
  0x10   :  { %vm33_vm5 = vcmask 917344   ;;  %vm39_vm6 = vcmask 884544   ;;  %vm45_vm7 = vcmask 851744   ;;  %vm51_vm8 = vcmask 818944  }
  0x11   :  { %vm57_vm9 = vcmask 786144   ;;  %vm63_vm10 = vcmask 753344   ;;  %vm69_vm11 = vcmask 720544   ;;  %vm75_vm12 = vcmask 687744  }
  0x12   :  { %55 = vrot.lane.b32.xlu0 %v205_v8, %s267_s7  ;;  %61 = vrot.lane.b32.xlu1 %v206_v9, %s268_s8  ;;  %s277_s8 = smov 52   ;;  %vm81_vm13 = vcmask 654944   ;;  %vm87_vm14 = vcmask 622144   ;;  %vm93_vm15 = vcmask 589344   ;;  %vm99_vm0 = vcmask 556544  }
  0x16   :  { %67 = vrot.lane.b32.xlu0 %v207_v11, %s269_s13  ;;  %73 = vrot.lane.b32.xlu1 %v208_v12, %s270_s14  ;;  %s279_s14 = smov 44  }
  0x1a   :  { %79 = vrot.lane.b32.xlu0 %v209_v13, %s271_s19  ;;  %85 = vrot.lane.b32.xlu1 %v210_v14, %s272_s20  ;;  %s281_s20 = smov 36  }
  0x1e   :  { %91 = vrot.lane.b32.xlu0 %v211_v15, %s273_s25  ;;  %97 = vrot.lane.b32.xlu1 %v212_v16, %s274_s26  ;;  %s283_s26 = smov 28  }
  0x22   :  { %103 = vrot.lane.b32.xlu0 %v213_v17, %s275_s2  ;;  %109 = vrot.lane.b32.xlu1 %v214_v18, %s276_s3  ;;  %s285_s3 = smov 20  }
  0x26   :  { %115 = vrot.lane.b32.xlu0 %v215_v19, %s277_s8  ;;  %121 = vrot.lane.b32.xlu1 %v216_v20, %s278_s9  ;;  %s287_s9 = smov 12  }
  0x2a   :  { %127 = vrot.lane.b32.xlu0 %v217_v21, %s279_s14  ;;  %133 = vrot.lane.b32.xlu1 %v218_v22, %s280_s15 }
  0x2e   :  { %139 = vrot.lane.b32.xlu0 %v219_v23, %s281_s20  ;;  %145 = vrot.lane.b32.xlu1 %v220_v24, %s282_s21 }
  0x32   :  { %151 = vrot.lane.b32.xlu0 %v221_v25, %s283_s26  ;;  %157 = vrot.lane.b32.xlu1 %v222_v26, %s284_s27 }
  0x36   :  { %163 = vrot.lane.b32.xlu0 %v223_v27, %s285_s3  ;;  %169 = vrot.lane.b32.xlu1 %v224_v28, %s286_s4 }
  0x3a   :  { %175 = vrot.lane.b32.xlu0 %v225_v29, %s287_s9  ;;  %181 = vrot.lane.b32.xlu1 %v226_v30, %s288_s10 }
  0x3e   :  { %187 = vrot.lane.b32.xlu0 %v227_v31, %s289_s0 }
  0x74   :  { %v8_v32 = vpop.permute.xlu0 %7   ;;  %v20_v33 = vpop.permute.xlu1 %19  }
  0x75   :  { %10 = vst.msk [vmem:[#allocation0] sm:$0x1] %vm9_vm1, %v8_v32   ;;  %vm105_vm1 = vcmask 523744  }
  0x78   :  { %v14_v34 = vpop.permute.xlu0 %13   ;;  %v26_v35 = vpop.permute.xlu1 %25  }
  0x79   :  { %16 = vst.msk [vmem:[#allocation0] sm:$0x1] %vm15_vm2, %v14_v34   ;;  %vm111_vm2 = vcmask 490944  }
  0x7a   :  { %22 = vst.msk [vmem:[#allocation0] sm:$0x1] %vm21_vm3, %v20_v33   ;;  %vm117_vm3 = vcmask 458144  }
  0x7b   :  { %28 = vst.msk [vmem:[#allocation0] sm:$0x1] %vm27_vm4, %v26_v35   ;;  %vm123_vm4 = vcmask 425344  }
  0x7c   :  { %v32_v36 = vpop.permute.xlu0 %31   ;;  %v38_v37 = vpop.permute.xlu1 %37  }
  0x7d   :  { %34 = vst.msk [vmem:[#allocation0] sm:$0x1] %vm33_vm5, %v32_v36   ;;  %vm129_vm5 = vcmask 392544  }
  0x7e   :  { %40 = vst.msk [vmem:[#allocation0] sm:$0x1] %vm39_vm6, %v38_v37   ;;  %vm135_vm6 = vcmask 359744  }
  0x80   :  { %v44_v38 = vpop.permute.xlu0 %43   ;;  %v50_v39 = vpop.permute.xlu1 %49  }
  0x81   :  { %46 = vst.msk [vmem:[#allocation0] sm:$0x1] %vm45_vm7, %v44_v38   ;;  %vm141_vm7 = vcmask 326944  }
  0x82   :  { %52 = vst.msk [vmem:[#allocation0] sm:$0x1] %vm51_vm8, %v50_v39   ;;  %vm147_vm8 = vcmask 294144  }
  0x84   :  { %v56_v40 = vpop.permute.xlu0 %55   ;;  %v62_v41 = vpop.permute.xlu1 %61  }
  0x85   :  { %58 = vst.msk [vmem:[#allocation0] sm:$0x1] %vm57_vm9, %v56_v40   ;;  %vm153_vm9 = vcmask 261344  }
  0x86   :  { %64 = vst.msk [vmem:[#allocation0] sm:$0x1] %vm63_vm10, %v62_v41   ;;  %vm159_vm10 = vcmask 228544  }
  0x88   :  { %v68_v42 = vpop.permute.xlu0 %67   ;;  %v74_v43 = vpop.permute.xlu1 %73  }
  0x89   :  { %70 = vst.msk [vmem:[#allocation0] sm:$0x1] %vm69_vm11, %v68_v42   ;;  %vm165_vm11 = vcmask 195744  }
  0x8a   :  { %76 = vst.msk [vmem:[#allocation0] sm:$0x1] %vm75_vm12, %v74_v43   ;;  %vm171_vm12 = vcmask 162944  }
  0x8c   :  { %v80_v44 = vpop.permute.xlu0 %79   ;;  %v86_v45 = vpop.permute.xlu1 %85  }
  0x8d   :  { %82 = vst.msk [vmem:[#allocation0] sm:$0x1] %vm81_vm13, %v80_v44   ;;  %vm177_vm13 = vcmask 130144  }
  0x8e   :  { %88 = vst.msk [vmem:[#allocation0] sm:$0x1] %vm87_vm14, %v86_v45   ;;  %vm183_vm14 = vcmask 97344  }
  0x90   :  { %v92_v46 = vpop.permute.xlu0 %91   ;;  %v98_v47 = vpop.permute.xlu1 %97  }
  0x91   :  { %94 = vst.msk [vmem:[#allocation0] sm:$0x1] %vm93_vm15, %v92_v46   ;;  %vm189_vm15 = vcmask 64544  }
  0x92   :  { %100 = vst.msk [vmem:[#allocation0] sm:$0x1] %vm99_vm0, %v98_v47  }
  0x94   :  { %v104_v48 = vpop.permute.xlu0 %103   ;;  %v110_v49 = vpop.permute.xlu1 %109  }
  0x95   :  { %106 = vst.msk [vmem:[#allocation0] sm:$0x1] %vm105_vm1, %v104_v48  }
  0x96   :  { %112 = vst.msk [vmem:[#allocation0] sm:$0x1] %vm111_vm2, %v110_v49  }
  0x98   :  { %v116_v50 = vpop.permute.xlu0 %115   ;;  %v122_v51 = vpop.permute.xlu1 %121  }
  0x99   :  { %118 = vst.msk [vmem:[#allocation0] sm:$0x1] %vm117_vm3, %v116_v50  }
  0x9a   :  { %124 = vst.msk [vmem:[#allocation0] sm:$0x1] %vm123_vm4, %v122_v51  }
  0x9c   :  { %v128_v52 = vpop.permute.xlu0 %127   ;;  %v134_v53 = vpop.permute.xlu1 %133  }
  0x9d   :  { %130 = vst.msk [vmem:[#allocation0] sm:$0x1] %vm129_vm5, %v128_v52  }
  0x9e   :  { %136 = vst.msk [vmem:[#allocation0] sm:$0x1] %vm135_vm6, %v134_v53  }
  0xa0   :  { %v140_v54 = vpop.permute.xlu0 %139   ;;  %v146_v55 = vpop.permute.xlu1 %145  }
  0xa1   :  { %142 = vst.msk [vmem:[#allocation0] sm:$0x1] %vm141_vm7, %v140_v54  }
  0xa2   :  { %148 = vst.msk [vmem:[#allocation0] sm:$0x1] %vm147_vm8, %v146_v55  }
  0xa4   :  { %v152_v56 = vpop.permute.xlu0 %151   ;;  %v158_v57 = vpop.permute.xlu1 %157  }
  0xa5   :  { %154 = vst.msk [vmem:[#allocation0] sm:$0x1] %vm153_vm9, %v152_v56  }
  0xa6   :  { %160 = vst.msk [vmem:[#allocation0] sm:$0x1] %vm159_vm10, %v158_v57  }
  0xa8   :  { %v164_v58 = vpop.permute.xlu0 %163   ;;  %v170_v59 = vpop.permute.xlu1 %169  }
  0xa9   :  { %166 = vst.msk [vmem:[#allocation0] sm:$0x1] %vm165_vm11, %v164_v58  }
  0xaa   :  { %172 = vst.msk [vmem:[#allocation0] sm:$0x1] %vm171_vm12, %v170_v59  }
  0xac   :  { %v176_v60 = vpop.permute.xlu0 %175   ;;  %v182_v61 = vpop.permute.xlu1 %181  }
  0xad   :  { %178 = vst.msk [vmem:[#allocation0] sm:$0x1] %vm177_vm13, %v176_v60  }
  0xae   :  { %184 = vst.msk [vmem:[#allocation0] sm:$0x1] %vm183_vm14, %v182_v61  }
  0xb0   :  { %v188_v62 = vpop.permute.xlu0 %187  }
  0xb1   :  { %190 = vst.msk [vmem:[#allocation0] sm:$0x1] %vm189_vm15, %v188_v62  }
  0xb8   :  { %v194_v63 = vld [vmem:[#allocation0] sm:$0x1] }
  0xb9   :  { %196 = vst [vmem:[%s400_s1] sm:$0x1] %v194_v63 }

// kernel: tile.46
= control target key start
LH: loop header
LB: loop body
LE: loop exit
PB: predicated region body
PF: predicated region fallthrough
CT: control target
= control target key end

     0   :  { %s515_s10 = smov 126   ;;  %s516_s11 = smov 122   ;;  %vm3_vm0 = vcmask 15360   ;;  %vm9_vm1 = vcmask 1048560   ;;  %vm21_vm2 = vcmask 1015760   ;;  %vm15_vm3 = vcmask 1032160   ;;  %s783_s0 = inlined_call_operand.vmem [shape: f32[64,2], index: 0, kind: input, shape index: {}]   ;;  %s784_s1 = inlined_call_operand.vmem [shape: f32[1,128], index: 1, kind: output, shape index: {}]  }
   0x1   :  { %v389_v0 = vld [vmem:[%s783_s0 + $0x3f] sm:$0x1]   ;;  %v391_v1 = vld [vmem:[%s783_s0 + $0x3d] sm:$0x1]   ;;  %v390_v2 = vld [vmem:[%s783_s0 + $0x3e] sm:$0x1]  }
   0x2   :  { %7 = vrot.lane.b32.xlu0 %v389_v0, %s515_s10  ;;  %19 = vrot.lane.b32.xlu1 %v391_v1, %s516_s11  ;;  %v392_v3 = vld [vmem:[%s783_s0 + $0x3c] sm:$0x1]   ;;  %s517_s16 = smov 124   ;;  %s518_s17 = smov 120   ;;  %v393_v4 = vld [vmem:[%s783_s0 + $0x3b] sm:$0x1]  }
   0x3   :  { %v394_v5 = vld [vmem:[%s783_s0 + $0x3a] sm:$0x1]   ;;  %s519_s22 = smov 118   ;;  %s520_s23 = smov 116   ;;  %v395_v6 = vld [vmem:[%s783_s0 + $0x39] sm:$0x1]  }
   0x4   :  { %v396_v7 = vld [vmem:[%s783_s0 + $0x38] sm:$0x1]   ;;  %s521_s28 = smov 114   ;;  %s522_s29 = smov 112   ;;  %v397_v8 = vld [vmem:[%s783_s0 + $0x37] sm:$0x1]  }
   0x5   :  { %v398_v9 = vld [vmem:[%s783_s0 + $0x36] sm:$0x1]   ;;  %s523_s5 = smov 110   ;;  %s524_s6 = smov 108   ;;  %v399_v10 = vld [vmem:[%s783_s0 + $0x35] sm:$0x1]  }
   0x6   :  { %13 = vrot.lane.b32.xlu0 %v390_v2, %s517_s16  ;;  %25 = vrot.lane.b32.xlu1 %v392_v3, %s518_s17  ;;  %v400_v11 = vld [vmem:[%s783_s0 + $0x34] sm:$0x1]   ;;  %s525_s11 = smov 106   ;;  %s526_s12 = smov 104   ;;  %v401_v12 = vld [vmem:[%s783_s0 + $0x33] sm:$0x1]  }
   0x7   :  { %v402_v13 = vld [vmem:[%s783_s0 + $0x32] sm:$0x1]   ;;  %s527_s17 = smov 102   ;;  %s528_s18 = smov 100   ;;  %v403_v14 = vld [vmem:[%s783_s0 + $0x31] sm:$0x1]  }
   0x8   :  { %v404_v15 = vld [vmem:[%s783_s0 + $0x30] sm:$0x1]   ;;  %v2_v16 = vld [vmem:[%s783_s0] sm:$0x1]   ;;  %s529_s25 = smov 98   ;;  %s530_s26 = smov 96  }
   0x9   :  { %v405_v17 = vld [vmem:[%s783_s0 + $0x2f] sm:$0x1]   ;;  %v406_v18 = vld [vmem:[%s783_s0 + $0x2e] sm:$0x1]   ;;  %4 = vst.msk [vmem:[#allocation0] sm:$0x1] %vm3_vm0, %v2_v16  }
   0xa   :  { %31 = vrot.lane.b32.xlu0 %v393_v4, %s519_s22  ;;  %37 = vrot.lane.b32.xlu1 %v394_v5, %s520_s23  ;;  %s531_s2 = smov 94   ;;  %s532_s3 = smov 92   ;;  %v407_v19 = vld [vmem:[%s783_s0 + $0x2d] sm:$0x1]   ;;  %v408_v20 = vld [vmem:[%s783_s0 + $0x2c] sm:$0x1]  }
   0xb   :  { %s533_s8 = smov 90   ;;  %s534_s9 = smov 88   ;;  %v409_v21 = vld [vmem:[%s783_s0 + $0x2b] sm:$0x1]   ;;  %v410_v22 = vld [vmem:[%s783_s0 + $0x2a] sm:$0x1]  }
   0xc   :  { %s535_s14 = smov 86   ;;  %s536_s15 = smov 84   ;;  %v411_v23 = vld [vmem:[%s783_s0 + $0x29] sm:$0x1]   ;;  %v412_v24 = vld [vmem:[%s783_s0 + $0x28] sm:$0x1]  }
   0xd   :  { %s537_s20 = smov 82   ;;  %s538_s21 = smov 80   ;;  %v413_v25 = vld [vmem:[%s783_s0 + $0x27] sm:$0x1]   ;;  %v414_v26 = vld [vmem:[%s783_s0 + $0x26] sm:$0x1]  }
   0xe   :  { %43 = vrot.lane.b32.xlu0 %v395_v6, %s521_s28  ;;  %49 = vrot.lane.b32.xlu1 %v396_v7, %s522_s29  ;;  %s540_s27 = smov 76   ;;  %v415_v27 = vld [vmem:[%s783_s0 + $0x25] sm:$0x1]   ;;  %v416_v28 = vld [vmem:[%s783_s0 + $0x24] sm:$0x1]   ;;  %s542_s4 = smov 72  }
   0xf   :  { %v417_v29 = vld [vmem:[%s783_s0 + $0x23] sm:$0x1]   ;;  %v418_v30 = vld [vmem:[%s783_s0 + $0x22] sm:$0x1]   ;;  %s544_s10 = smov 68   ;;  %s546_s16 = smov 64  }
  0x10   :  { %v419_v31 = vld [vmem:[%s783_s0 + $0x21] sm:$0x1]   ;;  %v420_v32 = vld [vmem:[%s783_s0 + $0x20] sm:$0x1]   ;;  %v421_v33 = vld [vmem:[%s783_s0 + $0x1f] sm:$0x1]  }
  0x11   :  { %v422_v34 = vld [vmem:[%s783_s0 + $0x1e] sm:$0x1]   ;;  %s548_s22 = smov 60   ;;  %v423_v35 = vld [vmem:[%s783_s0 + $0x1d] sm:$0x1]   ;;  %s550_s28 = smov 56  }
  0x12   :  { %55 = vrot.lane.b32.xlu0 %v397_v8, %s523_s5  ;;  %61 = vrot.lane.b32.xlu1 %v398_v9, %s524_s6  ;;  %v424_v36 = vld [vmem:[%s783_s0 + $0x1c] sm:$0x1]   ;;  %v425_v37 = vld [vmem:[%s783_s0 + $0x1b] sm:$0x1]   ;;  %s552_s5 = smov 52   ;;  %s558_s23 = smov 40  }
  0x13   :  { %v426_v38 = vld [vmem:[%s783_s0 + $0x1a] sm:$0x1]   ;;  %v427_v39 = vld [vmem:[%s783_s0 + $0x19] sm:$0x1]   ;;  %v428_v40 = vld [vmem:[%s783_s0 + $0x18] sm:$0x1]  }
  0x14   :  { %v429_v41 = vld [vmem:[%s783_s0 + $0x17] sm:$0x1]   ;;  %v430_v42 = vld [vmem:[%s783_s0 + $0x16] sm:$0x1]   ;;  %v431_v43 = vld [vmem:[%s783_s0 + $0x15] sm:$0x1]  }
  0x15   :  { %v432_v44 = vld [vmem:[%s783_s0 + $0x14] sm:$0x1]   ;;  %v433_v45 = vld [vmem:[%s783_s0 + $0x13] sm:$0x1]   ;;  %v434_v46 = vld [vmem:[%s783_s0 + $0x12] sm:$0x1]  }
  0x16   :  { %67 = vrot.lane.b32.xlu0 %v399_v10, %s525_s11  ;;  %73 = vrot.lane.b32.xlu1 %v400_v11, %s526_s12  ;;  %s554_s11 = smov 48   ;;  %s560_s29 = smov 36   ;;  %v435_v47 = vld [vmem:[%s783_s0 + $0x11] sm:$0x1]   ;;  %v436_v48 = vld [vmem:[%s783_s0 + $0x10] sm:$0x1]  }
  0x17   :  { %s562_s6 = smov 32   ;;  %v437_v49 = vld [vmem:[%s783_s0 + $0xf] sm:$0x1]   ;;  %v438_v50 = vld [vmem:[%s783_s0 + $0xe] sm:$0x1]   ;;  %s564_s12 = smov 28  }
  0x18   :  { %v439_v51 = vld [vmem:[%s783_s0 + $0xd] sm:$0x1]   ;;  %v440_v52 = vld [vmem:[%s783_s0 + $0xc] sm:$0x1]   ;;  %v441_v53 = vld [vmem:[%s783_s0 + $0xb] sm:$0x1]  }
  0x19   :  { %v442_v54 = vld [vmem:[%s783_s0 + $0xa] sm:$0x1]   ;;  %s568_s24 = smov 20   ;;  %v443_v55 = vld [vmem:[%s783_s0 + $0x9] sm:$0x1]   ;;  %s570_s30 = smov 16  }
  0x1a   :  { %79 = vrot.lane.b32.xlu0 %v401_v12, %s527_s17  ;;  %85 = vrot.lane.b32.xlu1 %v402_v13, %s528_s18  ;;  %s556_s17 = smov 44   ;;  %s566_s18 = smov 24   ;;  %v444_v56 = vld [vmem:[%s783_s0 + $0x8] sm:$0x1]   ;;  %v445_v57 = vld [vmem:[%s783_s0 + $0x7] sm:$0x1]  }
  0x1b   :  { %v446_v58 = vld [vmem:[%s783_s0 + $0x6] sm:$0x1]   ;;  %s572_s7 = smov 12   ;;  %v447_v59 = vld [vmem:[%s783_s0 + $0x5] sm:$0x1]   ;;  %s574_s13 = smov 8  }
  0x1c   :  { %v448_v60 = vld [vmem:[%s783_s0 + $0x4] sm:$0x1]   ;;  %v449_v63 = vld [vmem:[%s783_s0 + $0x3] sm:$0x1]   ;;  %v450_v0 = vld [vmem:[%s783_s0 + $0x2] sm:$0x1]  }
  0x1d   :  { %vm27_vm4 = vcmask 999360   ;;  %vm33_vm5 = vcmask 982960   ;;  %s576_s19 = smov 4   ;;  %v451_v3 = vld [vmem:[%s783_s0 + $0x1] sm:$0x1]   ;;  %vm39_vm6 = vcmask 966560  }
  0x1e   :  { %91 = vrot.lane.b32.xlu0 %v403_v14, %s529_s25  ;;  %97 = vrot.lane.b32.xlu1 %v404_v15, %s530_s26  ;;  %s539_s26 = smov 78   ;;  %s577_s0 = smov 2   ;;  %vm45_vm7 = vcmask 950160   ;;  %vm51_vm8 = vcmask 933760   ;;  %vm57_vm9 = vcmask 917360   ;;  %vm63_vm10 = vcmask 900960  }
  0x1f   :  { %vm69_vm11 = vcmask 884560   ;;  %vm75_vm12 = vcmask 868160   ;;  %vm81_vm13 = vcmask 851760   ;;  %vm87_vm14 = vcmask 835360  }
  0x20   :  { %vm93_vm15 = vcmask 818960   ;;  %vm99_vm0 = vcmask 802560  }
  0x22   :  { %103 = vrot.lane.b32.xlu0 %v405_v17, %s531_s2  ;;  %109 = vrot.lane.b32.xlu1 %v406_v18, %s532_s3  ;;  %s541_s3 = smov 74  }
  0x26   :  { %115 = vrot.lane.b32.xlu0 %v407_v19, %s533_s8  ;;  %121 = vrot.lane.b32.xlu1 %v408_v20, %s534_s9  ;;  %s543_s9 = smov 70  }
  0x2a   :  { %127 = vrot.lane.b32.xlu0 %v409_v21, %s535_s14  ;;  %133 = vrot.lane.b32.xlu1 %v410_v22, %s536_s15  ;;  %s545_s15 = smov 66  }
  0x2e   :  { %139 = vrot.lane.b32.xlu0 %v411_v23, %s537_s20  ;;  %145 = vrot.lane.b32.xlu1 %v412_v24, %s538_s21  ;;  %s547_s21 = smov 62  }
  0x32   :  { %151 = vrot.lane.b32.xlu0 %v413_v25, %s539_s26  ;;  %157 = vrot.lane.b32.xlu1 %v414_v26, %s540_s27  ;;  %s549_s27 = smov 58  }
  0x36   :  { %163 = vrot.lane.b32.xlu0 %v415_v27, %s541_s3  ;;  %169 = vrot.lane.b32.xlu1 %v416_v28, %s542_s4  ;;  %s551_s4 = smov 54  }
  0x3a   :  { %175 = vrot.lane.b32.xlu0 %v417_v29, %s543_s9  ;;  %181 = vrot.lane.b32.xlu1 %v418_v30, %s544_s10  ;;  %s553_s10 = smov 50  }
  0x3e   :  { %187 = vrot.lane.b32.xlu0 %v419_v31, %s545_s15  ;;  %193 = vrot.lane.b32.xlu1 %v420_v32, %s546_s16  ;;  %s555_s16 = smov 46  }
  0x42   :  { %199 = vrot.lane.b32.xlu0 %v421_v33, %s547_s21  ;;  %205 = vrot.lane.b32.xlu1 %v422_v34, %s548_s22  ;;  %s557_s22 = smov 42  }
  0x46   :  { %211 = vrot.lane.b32.xlu0 %v423_v35, %s549_s27  ;;  %217 = vrot.lane.b32.xlu1 %v424_v36, %s550_s28  ;;  %s559_s28 = smov 38  }
  0x4a   :  { %223 = vrot.lane.b32.xlu0 %v425_v37, %s551_s4  ;;  %229 = vrot.lane.b32.xlu1 %v426_v38, %s552_s5  ;;  %s561_s5 = smov 34  }
  0x4e   :  { %235 = vrot.lane.b32.xlu0 %v427_v39, %s553_s10  ;;  %241 = vrot.lane.b32.xlu1 %v428_v40, %s554_s11  ;;  %s563_s11 = smov 30  }
  0x52   :  { %247 = vrot.lane.b32.xlu0 %v429_v41, %s555_s16  ;;  %253 = vrot.lane.b32.xlu1 %v430_v42, %s556_s17  ;;  %s565_s17 = smov 26  }
  0x56   :  { %259 = vrot.lane.b32.xlu0 %v431_v43, %s557_s22  ;;  %265 = vrot.lane.b32.xlu1 %v432_v44, %s558_s23  ;;  %s567_s23 = smov 22  }
  0x5a   :  { %271 = vrot.lane.b32.xlu0 %v433_v45, %s559_s28  ;;  %277 = vrot.lane.b32.xlu1 %v434_v46, %s560_s29  ;;  %s569_s29 = smov 18  }
  0x5e   :  { %283 = vrot.lane.b32.xlu0 %v435_v47, %s561_s5  ;;  %289 = vrot.lane.b32.xlu1 %v436_v48, %s562_s6  ;;  %s571_s6 = smov 14  }
  0x62   :  { %295 = vrot.lane.b32.xlu0 %v437_v49, %s563_s11  ;;  %301 = vrot.lane.b32.xlu1 %v438_v50, %s564_s12  ;;  %s573_s12 = smov 10  }
  0x66   :  { %307 = vrot.lane.b32.xlu0 %v439_v51, %s565_s17  ;;  %313 = vrot.lane.b32.xlu1 %v440_v52, %s566_s18  ;;  %s575_s18 = smov 6  }
  0x6a   :  { %319 = vrot.lane.b32.xlu0 %v441_v53, %s567_s23  ;;  %325 = vrot.lane.b32.xlu1 %v442_v54, %s568_s24 }
  0x6e   :  { %331 = vrot.lane.b32.xlu0 %v443_v55, %s569_s29  ;;  %337 = vrot.lane.b32.xlu1 %v444_v56, %s570_s30 }
  0x72   :  { %343 = vrot.lane.b32.xlu0 %v445_v57, %s571_s6  ;;  %349 = vrot.lane.b32.xlu1 %v446_v58, %s572_s7 }
  0x74   :  { %v8_v61 = vpop.permute.xlu0 %7   ;;  %v20_v62 = vpop.permute.xlu1 %19  }
  0x75   :  { %10 = vst.msk [vmem:[#allocation0] sm:$0x1] %vm9_vm1, %v8_v61   ;;  %vm105_vm1 = vcmask 786160  }
  0x76   :  { %355 = vrot.lane.b32.xlu0 %v447_v59, %s573_s12  ;;  %361 = vrot.lane.b32.xlu1 %v448_v60, %s574_s13 }
  0x78   :  { %v14_v1 = vpop.permute.xlu0 %13   ;;  %v26_v2 = vpop.permute.xlu1 %25  }
  0x79   :  { %16 = vst.msk [vmem:[#allocation0] sm:$0x1] %vm15_vm3, %v14_v1   ;;  %vm117_vm3 = vcmask 753360  }
  0x7a   :  { %22 = vst.msk [vmem:[#allocation0] sm:$0x1] %vm21_vm2, %v20_v62   ;;  %367 = vrot.lane.b32.xlu0 %v449_v63, %s575_s18  ;;  %373 = vrot.lane.b32.xlu1 %v450_v0, %s576_s19  ;;  %vm111_vm2 = vcmask 769760  }
  0x7b   :  { %28 = vst.msk [vmem:[#allocation0] sm:$0x1] %vm27_vm4, %v26_v2   ;;  %vm123_vm4 = vcmask 736960  }
  0x7c   :  { %v32_v4 = vpop.permute.xlu0 %31   ;;  %v38_v5 = vpop.permute.xlu1 %37  }
  0x7d   :  { %34 = vst.msk [vmem:[#allocation0] sm:$0x1] %vm33_vm5, %v32_v4   ;;  %vm129_vm5 = vcmask 720560  }
  0x7e   :  { %379 = vrot.lane.b32.xlu0 %v451_v3, %s577_s0  ;;  %40 = vst.msk [vmem:[#allocation0] sm:$0x1] %vm39_vm6, %v38_v5   ;;  %vm135_vm6 = vcmask 704160  }
  0x80   :  { %v44_v6 = vpop.permute.xlu0 %43   ;;  %v50_v7 = vpop.permute.xlu1 %49  }
  0x81   :  { %46 = vst.msk [vmem:[#allocation0] sm:$0x1] %vm45_vm7, %v44_v6   ;;  %vm141_vm7 = vcmask 687760  }
  0x82   :  { %52 = vst.msk [vmem:[#allocation0] sm:$0x1] %vm51_vm8, %v50_v7   ;;  %vm147_vm8 = vcmask 671360  }
  0x84   :  { %v56_v8 = vpop.permute.xlu0 %55   ;;  %v62_v9 = vpop.permute.xlu1 %61  }
  0x85   :  { %58 = vst.msk [vmem:[#allocation0] sm:$0x1] %vm57_vm9, %v56_v8   ;;  %vm153_vm9 = vcmask 654960  }
  0x86   :  { %64 = vst.msk [vmem:[#allocation0] sm:$0x1] %vm63_vm10, %v62_v9   ;;  %vm159_vm10 = vcmask 638560  }
  0x88   :  { %v68_v10 = vpop.permute.xlu0 %67   ;;  %v74_v11 = vpop.permute.xlu1 %73  }
  0x89   :  { %70 = vst.msk [vmem:[#allocation0] sm:$0x1] %vm69_vm11, %v68_v10   ;;  %vm165_vm11 = vcmask 622160  }
  0x8a   :  { %76 = vst.msk [vmem:[#allocation0] sm:$0x1] %vm75_vm12, %v74_v11   ;;  %vm171_vm12 = vcmask 605760  }
  0x8c   :  { %v80_v12 = vpop.permute.xlu0 %79   ;;  %v86_v13 = vpop.permute.xlu1 %85  }
  0x8d   :  { %82 = vst.msk [vmem:[#allocation0] sm:$0x1] %vm81_vm13, %v80_v12   ;;  %vm177_vm13 = vcmask 589360  }
  0x8e   :  { %88 = vst.msk [vmem:[#allocation0] sm:$0x1] %vm87_vm14, %v86_v13   ;;  %vm183_vm14 = vcmask 572960  }
  0x90   :  { %v92_v14 = vpop.permute.xlu0 %91   ;;  %v98_v15 = vpop.permute.xlu1 %97  }
  0x91   :  { %94 = vst.msk [vmem:[#allocation0] sm:$0x1] %vm93_vm15, %v92_v14   ;;  %vm189_vm15 = vcmask 556560  }
  0x92   :  { %100 = vst.msk [vmem:[#allocation0] sm:$0x1] %vm99_vm0, %v98_v15   ;;  %vm195_vm0 = vcmask 540160  }
  0x94   :  { %v104_v16 = vpop.permute.xlu0 %103   ;;  %v110_v17 = vpop.permute.xlu1 %109  }
  0x95   :  { %106 = vst.msk [vmem:[#allocation0] sm:$0x1] %vm105_vm1, %v104_v16   ;;  %vm201_vm1 = vcmask 523760  }
  0x96   :  { %112 = vst.msk [vmem:[#allocation0] sm:$0x1] %vm111_vm2, %v110_v17   ;;  %vm207_vm2 = vcmask 507360  }
  0x98   :  { %v116_v18 = vpop.permute.xlu0 %115   ;;  %v122_v19 = vpop.permute.xlu1 %121  }
  0x99   :  { %118 = vst.msk [vmem:[#allocation0] sm:$0x1] %vm117_vm3, %v116_v18   ;;  %vm213_vm3 = vcmask 490960  }
  0x9a   :  { %124 = vst.msk [vmem:[#allocation0] sm:$0x1] %vm123_vm4, %v122_v19   ;;  %vm219_vm4 = vcmask 474560  }
  0x9c   :  { %v128_v20 = vpop.permute.xlu0 %127   ;;  %v134_v21 = vpop.permute.xlu1 %133  }
  0x9d   :  { %130 = vst.msk [vmem:[#allocation0] sm:$0x1] %vm129_vm5, %v128_v20   ;;  %vm225_vm5 = vcmask 458160  }
  0x9e   :  { %136 = vst.msk [vmem:[#allocation0] sm:$0x1] %vm135_vm6, %v134_v21   ;;  %vm231_vm6 = vcmask 441760  }
  0xa0   :  { %v140_v22 = vpop.permute.xlu0 %139   ;;  %v146_v23 = vpop.permute.xlu1 %145  }
  0xa1   :  { %142 = vst.msk [vmem:[#allocation0] sm:$0x1] %vm141_vm7, %v140_v22   ;;  %vm237_vm7 = vcmask 425360  }
  0xa2   :  { %148 = vst.msk [vmem:[#allocation0] sm:$0x1] %vm147_vm8, %v146_v23   ;;  %vm243_vm8 = vcmask 408960  }
  0xa4   :  { %v152_v24 = vpop.permute.xlu0 %151   ;;  %v158_v25 = vpop.permute.xlu1 %157  }
  0xa5   :  { %154 = vst.msk [vmem:[#allocation0] sm:$0x1] %vm153_vm9, %v152_v24   ;;  %vm249_vm9 = vcmask 392560  }
  0xa6   :  { %160 = vst.msk [vmem:[#allocation0] sm:$0x1] %vm159_vm10, %v158_v25   ;;  %vm255_vm10 = vcmask 376160  }
  0xa8   :  { %v164_v26 = vpop.permute.xlu0 %163   ;;  %v170_v27 = vpop.permute.xlu1 %169  }
  0xa9   :  { %166 = vst.msk [vmem:[#allocation0] sm:$0x1] %vm165_vm11, %v164_v26   ;;  %vm261_vm11 = vcmask 359760  }
  0xaa   :  { %172 = vst.msk [vmem:[#allocation0] sm:$0x1] %vm171_vm12, %v170_v27   ;;  %vm267_vm12 = vcmask 343360  }
  0xac   :  { %v176_v28 = vpop.permute.xlu0 %175   ;;  %v182_v29 = vpop.permute.xlu1 %181  }
  0xad   :  { %178 = vst.msk [vmem:[#allocation0] sm:$0x1] %vm177_vm13, %v176_v28   ;;  %vm273_vm13 = vcmask 326960  }
  0xae   :  { %184 = vst.msk [vmem:[#allocation0] sm:$0x1] %vm183_vm14, %v182_v29   ;;  %vm279_vm14 = vcmask 310560  }
  0xb0   :  { %v188_v30 = vpop.permute.xlu0 %187   ;;  %v194_v31 = vpop.permute.xlu1 %193  }
  0xb1   :  { %190 = vst.msk [vmem:[#allocation0] sm:$0x1] %vm189_vm15, %v188_v30   ;;  %vm285_vm15 = vcmask 294160  }
  0xb2   :  { %196 = vst.msk [vmem:[#allocation0] sm:$0x1] %vm195_vm0, %v194_v31   ;;  %vm291_vm0 = vcmask 277760  }
  0xb4   :  { %v200_v32 = vpop.permute.xlu0 %199   ;;  %v206_v33 = vpop.permute.xlu1 %205  }
  0xb5   :  { %202 = vst.msk [vmem:[#allocation0] sm:$0x1] %vm201_vm1, %v200_v32   ;;  %vm297_vm1 = vcmask 261360  }
  0xb6   :  { %208 = vst.msk [vmem:[#allocation0] sm:$0x1] %vm207_vm2, %v206_v33   ;;  %vm303_vm2 = vcmask 244960  }
  0xb8   :  { %v212_v34 = vpop.permute.xlu0 %211   ;;  %v218_v35 = vpop.permute.xlu1 %217  }
  0xb9   :  { %214 = vst.msk [vmem:[#allocation0] sm:$0x1] %vm213_vm3, %v212_v34   ;;  %vm309_vm3 = vcmask 228560  }
  0xba   :  { %220 = vst.msk [vmem:[#allocation0] sm:$0x1] %vm219_vm4, %v218_v35   ;;  %vm315_vm4 = vcmask 212160  }
  0xbc   :  { %v224_v36 = vpop.permute.xlu0 %223   ;;  %v230_v37 = vpop.permute.xlu1 %229  }
  0xbd   :  { %226 = vst.msk [vmem:[#allocation0] sm:$0x1] %vm225_vm5, %v224_v36   ;;  %vm321_vm5 = vcmask 195760  }
  0xbe   :  { %232 = vst.msk [vmem:[#allocation0] sm:$0x1] %vm231_vm6, %v230_v37   ;;  %vm327_vm6 = vcmask 179360  }
  0xc0   :  { %v236_v38 = vpop.permute.xlu0 %235   ;;  %v242_v39 = vpop.permute.xlu1 %241  }
  0xc1   :  { %238 = vst.msk [vmem:[#allocation0] sm:$0x1] %vm237_vm7, %v236_v38   ;;  %vm333_vm7 = vcmask 162960  }
  0xc2   :  { %244 = vst.msk [vmem:[#allocation0] sm:$0x1] %vm243_vm8, %v242_v39   ;;  %vm339_vm8 = vcmask 146560  }
  0xc4   :  { %v248_v40 = vpop.permute.xlu0 %247   ;;  %v254_v41 = vpop.permute.xlu1 %253  }
  0xc5   :  { %250 = vst.msk [vmem:[#allocation0] sm:$0x1] %vm249_vm9, %v248_v40   ;;  %vm345_vm9 = vcmask 130160  }
  0xc6   :  { %256 = vst.msk [vmem:[#allocation0] sm:$0x1] %vm255_vm10, %v254_v41   ;;  %vm351_vm10 = vcmask 113760  }
  0xc8   :  { %v260_v42 = vpop.permute.xlu0 %259   ;;  %v266_v43 = vpop.permute.xlu1 %265  }
  0xc9   :  { %262 = vst.msk [vmem:[#allocation0] sm:$0x1] %vm261_vm11, %v260_v42   ;;  %vm357_vm11 = vcmask 97360  }
  0xca   :  { %268 = vst.msk [vmem:[#allocation0] sm:$0x1] %vm267_vm12, %v266_v43   ;;  %vm363_vm12 = vcmask 80960  }
  0xcc   :  { %v272_v44 = vpop.permute.xlu0 %271   ;;  %v278_v45 = vpop.permute.xlu1 %277  }
  0xcd   :  { %274 = vst.msk [vmem:[#allocation0] sm:$0x1] %vm273_vm13, %v272_v44   ;;  %vm369_vm13 = vcmask 64560  }
  0xce   :  { %280 = vst.msk [vmem:[#allocation0] sm:$0x1] %vm279_vm14, %v278_v45   ;;  %vm375_vm14 = vcmask 48160  }
  0xd0   :  { %v284_v46 = vpop.permute.xlu0 %283   ;;  %v290_v47 = vpop.permute.xlu1 %289  }
  0xd1   :  { %286 = vst.msk [vmem:[#allocation0] sm:$0x1] %vm285_vm15, %v284_v46   ;;  %vm381_vm15 = vcmask 31760  }
  0xd2   :  { %292 = vst.msk [vmem:[#allocation0] sm:$0x1] %vm291_vm0, %v290_v47  }
  0xd4   :  { %v296_v48 = vpop.permute.xlu0 %295   ;;  %v302_v49 = vpop.permute.xlu1 %301  }
  0xd5   :  { %298 = vst.msk [vmem:[#allocation0] sm:$0x1] %vm297_vm1, %v296_v48  }
  0xd6   :  { %304 = vst.msk [vmem:[#allocation0] sm:$0x1] %vm303_vm2, %v302_v49  }
  0xd8   :  { %v308_v50 = vpop.permute.xlu0 %307   ;;  %v314_v51 = vpop.permute.xlu1 %313  }
  0xd9   :  { %310 = vst.msk [vmem:[#allocation0] sm:$0x1] %vm309_vm3, %v308_v50  }
  0xda   :  { %316 = vst.msk [vmem:[#allocation0] sm:$0x1] %vm315_vm4, %v314_v51  }
  0xdc   :  { %v320_v52 = vpop.permute.xlu0 %319   ;;  %v326_v53 = vpop.permute.xlu1 %325  }
  0xdd   :  { %322 = vst.msk [vmem:[#allocation0] sm:$0x1] %vm321_vm5, %v320_v52  }
  0xde   :  { %328 = vst.msk [vmem:[#allocation0] sm:$0x1] %vm327_vm6, %v326_v53  }
  0xe0   :  { %v332_v54 = vpop.permute.xlu0 %331   ;;  %v338_v55 = vpop.permute.xlu1 %337  }
  0xe1   :  { %334 = vst.msk [vmem:[#allocation0] sm:$0x1] %vm333_vm7, %v332_v54  }
  0xe2   :  { %340 = vst.msk [vmem:[#allocation0] sm:$0x1] %vm339_vm8, %v338_v55  }
  0xe4   :  { %v344_v56 = vpop.permute.xlu0 %343   ;;  %v350_v57 = vpop.permute.xlu1 %349  }
  0xe5   :  { %346 = vst.msk [vmem:[#allocation0] sm:$0x1] %vm345_vm9, %v344_v56  }
  0xe6   :  { %352 = vst.msk [vmem:[#allocation0] sm:$0x1] %vm351_vm10, %v350_v57  }
  0xe8   :  { %v356_v58 = vpop.permute.xlu0 %355   ;;  %v362_v59 = vpop.permute.xlu1 %361  }
  0xe9   :  { %358 = vst.msk [vmem:[#allocation0] sm:$0x1] %vm357_vm11, %v356_v58  }
  0xea   :  { %364 = vst.msk [vmem:[#allocation0] sm:$0x1] %vm363_vm12, %v362_v59  }
  0xec   :  { %v368_v60 = vpop.permute.xlu0 %367   ;;  %v374_v61 = vpop.permute.xlu1 %373  }
  0xed   :  { %370 = vst.msk [vmem:[#allocation0] sm:$0x1] %vm369_vm13, %v368_v60  }
  0xee   :  { %376 = vst.msk [vmem:[#allocation0] sm:$0x1] %vm375_vm14, %v374_v61  }
  0xf0   :  { %v380_v62 = vpop.permute.xlu0 %379  }
  0xf1   :  { %382 = vst.msk [vmem:[#allocation0] sm:$0x1] %vm381_vm15, %v380_v62  }
  0xf8   :  { %v386_v63 = vld [vmem:[#allocation0] sm:$0x1] }
  0xf9   :  { %388 = vst [vmem:[%s784_s1] sm:$0x1] %v386_v63 }

// kernel: bbox_transform.1
= control target key start
LH: loop header
LB: loop body
LE: loop exit
PB: predicated region body
PF: predicated region fallthrough
CT: control target
= control target key end

     0   :  { %s367_s12 = smov 0   ;;  %s407_s0 = inlined_call_operand.vmem [shape: f32[8,128], index: 0, kind: input, shape index: {}]   ;;  %s408_s1 = inlined_call_operand.vmem [shape: f32[16,128], index: 1, kind: input, shape index: {}]   ;;  %s409_s2 = inlined_call_operand.vmem [shape: f32[16,128], index: 2, kind: input, shape index: {}]   ;;  %s410_s3 = inlined_call_operand.vmem [shape: f32[16,128], index: 3, kind: output, shape index: {}]  }
   0x1 LB: > { %s309_s13 = sadd.s32 4294967295, %s342_s12   ;;  %p313_p0 = scmp.ge.s32.totalorder %s342_s12, 1  ;;  %s342_s12 = sphi %s367_s12, %s13_s12  }
   0x2   : > { %p145_p1 = scmp.lt.s32.totalorder %s342_s12, 3 }
   0x4   : > { %p146_p2 = pnand %p313_p0, %p145_p1 }
   0x5   : > { %p171_p3 = scmp.lt.s32.totalorder (!%p146_p2), %s309_s13, 1  ;;  %s344_s21 = smov (!%p146_p2), 126   ;;  %v200_v2 = vlaneseq (!%p146_p2)  ;;  %v189_v3 = vld [vmem:[%s407_s0 + $0x4] sm:$0x1] (!%p146_p2)  ;;  %v346_v6 = vmov (!%p146_p2), 0  }
   0x6   : > { %149 = sbr.rel (%p146_p2) target bundleno = 157 (0x9d), region = 32  ;;  %s345_s22 = smov (!%p146_p2), 2   ;;  %vm190_vm0 = vcmp.gt.f32.partialorder (!%p146_p2), %v189_v3, 0.0  ;;  %v319_v9 = vld [vmem:[%s407_s0 + $0x3] ss:$0 sm:$0xff] (!%p146_p2) }
   0x7   : > { %v201_v4 = vshrl.u32 (!%p146_p2), %v200_v2, 7  ;;  %v199_v7 = vsel (!%p146_p2), %vm190_vm0, 1, %v346_v6  ;;  %v320_v11 = vld [vmem:[%s407_s0 + $0x1] ss:$0 sm:$0xff] (!%p146_p2)  ;;  %v317_v20 = vld [vmem:[%s407_s0 + $0x2] ss:$0 sm:$0xff] (!%p146_p2) }
   0x8   : > { %v318_v25 = vld [vmem:[%s407_s0] ss:$0 sm:$0xff] (!%p146_p2) }
   0x9   : > { %v202_v5 = vsub.s32 (!%p146_p2), 0, %v201_v4 }
   0xb   : > { %v203_v8 = vrot.slane (!%p146_p2), %v199_v7, %v202_v5  ;;  %v240_v28 = vrot.slane (!%p146_p2), %v189_v3, %v202_v5 }
   0xd   : > { %s412_s13 = smov (!%p171_p3, %s309_s13), 1  ;;  %vm204_vm1 = vcmp.eq.s32.totalorder %v203_v8, 1 }
   0xe   : > { %s375_s14 = sshll.u32 %s412_s13, 3 }
   0xf   : > { %s178_s17 = scalar_lea.vmem %s409_s2, %s375_s14  ;;  %s174_s20 = scalar_lea.vmem %s408_s1, %s375_s14 }
  0x10   : > { %v184_v0 = vld [vmem:[%s178_s17] sm:$0xff]  ;;  %s182_s8 = scalar_lea.vmem %s410_s3, %s375_s14 }
  0x11   : > { %197 = vrot.lane.b32.xlu0 %v184_v0, %s344_s21  ;;  %v183_v1 = vld [vmem:[%s174_s20] sm:$0xff] }
  0x12   : > { %193 = vrot.lane.b32.xlu1 %v183_v1, %s344_s21 }
  0x15   : > { %191 = vrot.lane.b32.xlu0 %v183_v1, %s345_s22 }
  0x16   : > { %195 = vrot.lane.b32.xlu1 %v184_v0, %s345_s22 }
  0x83   : > { %v198_v10 = vpop.permute.xlu0 %197 }
  0x84   : > { %v208_v12 = vsel %vm204_vm1, %v184_v0, %v198_v10  ;;  %v194_v13 = vpop.permute.xlu1 %193 }
  0x85   : > { %v226_v14 = vmul.f32 %v319_v9, %v208_v12  ;;  %v206_v19 = vsel %vm204_vm1, %v183_v1, %v194_v13 }
  0x87   : > { %v231_v15 = vadd.f32 %v320_v11, %v226_v14  ;;  %v192_v16 = vpop.permute.xlu0 %191 }
  0x88   : > { %v196_v17 = vpop.permute.xlu1 %195  ;;  %v205_v22 = vsel %vm204_vm1, %v192_v16, %v183_v1 }
  0x89   : > { %v234_v18 = vmul.f32 1.442695, %v231_v15  ;;  %v207_v21 = vsel %vm204_vm1, %v196_v17, %v184_v0  ;;  %v209_v24 = vsub.f32 %v206_v19, %v205_v22 }
  0x8a   : > { %v216_v23 = vmul.f32 %v317_v20, %v207_v21 }
  0x8b   : > { %334 = vpow2.f32 %v234_v18  ;;  %v210_v27 = vmul.f32 0.5, %v209_v24 }
  0x8c   : > { %v221_v26 = vadd.f32 %v318_v25, %v216_v23 }
  0x8d   : > { %v211_v29 = vadd.f32 %v210_v27, %v205_v22 }
  0x8e   : > { %v232_v30 = vmul.f32 %v221_v26, %v209_v24 }
  0x90   : > { %v233_v33 = vadd.f32 %v232_v30, %v211_v29 }
  0x95   : > { %v335_v31 = vpop.eup %334 }
  0x96   : > { %v236_v32 = vmul.f32 %v335_v31, %v209_v24 }
  0x98   : > { %v241_v34 = vmul.f32 %v240_v28, %v236_v32 }
  0x9a   : > { %v242_v35 = vadd.f32 %v241_v34, %v233_v33 }
  0x9c   : > { %243 = vst [vmem:[%s182_s8] sm:$0xff] %v242_v35 }
  0x9d PF: > { %s13_s12 = sadd.s32 1, %s342_s12  }
  0x9e   : > { %p10_p4 = scmp.ge.s32.totalorder %s13_s12, 4  }
  0xa0   :  { %12 = sbr.rel (!%p10_p4) target bundleno = 1 (0x1), region = 65 }

</bundles_post_ra>
